<compile_context>
chip_gen: v7x
topology: tpu7x:2x2x1
jax: 0.10.0
libtpu: 0.0.40
codegen_flags: <defaults>
</compile_context>

<pallas_src>
import math
from functools import partial

import jax
import jax.numpy as jnp
from jax import lax
from jax.experimental import pallas as pl
from jax.experimental.pallas import tpu as pltpu


def _round_up(x, m):
    return ((x + m - 1) // m) * m


def _pad2d(x, rows, cols):
    pr = rows - x.shape[0]
    pc = cols - x.shape[1]
    if pr == 0 and pc == 0:
        return x
    return jnp.pad(x, ((0, pr), (0, pc)))


def _linear_mn_kernel(sp_ref, xm_ref, xv_ref, w_ref, b_ref,
                      om_ref, ov_ref, acc_m, acc_v, *, mxu_dtype):
    k = pl.program_id(2)

    @pl.when(k == 0)
    def _init():
        acc_m[...] = jnp.zeros_like(acc_m)
        acc_v[...] = jnp.zeros_like(acc_v)

    xm = xm_ref[...]          # (tm, tk) f32
    xv = xv_ref[...]          # (tm, tk) f32
    w = w_ref[...]            # (tn, tk) f32  (one HBM read feeds both dots)
    sp = sp_ref[...]          # (1, tk)  f32  (precomputed softplus, zero-padded)

    # Contract the last axis of both operands -> no transpose materialized.
    dn = (((1,), (1,)), ((), ()))

    # Mean path: xm @ W.T
    acc_m[...] += lax.dot_general(
        xm.astype(mxu_dtype), w.astype(mxu_dtype), dn,
        preferred_element_type=jnp.float32)

    # Variance path: ((1+sp)*xv + sp*xm^2) @ (W^2).T
    # Elementwise mixing stays in f32 (v5e VPU has no bf16; precision).
    v_in = (1.0 + sp) * xv + sp * (xm * xm)
    w_sq = w * w
    acc_v[...] += lax.dot_general(
        v_in.astype(mxu_dtype), w_sq.astype(mxu_dtype), dn,
        preferred_element_type=jnp.float32)

    @pl.when(k == pl.num_programs(2) - 1)
    def _finalize():
        om_ref[...] = (acc_m[...] + b_ref[...]).astype(om_ref.dtype)
        ov_ref[...] = acc_v[...].astype(ov_ref.dtype)


def _vmem_limit_bytes(tm, tn, tk):
    f32 = 4
    inputs = 2 * (2 * tm * tk + tn * tk + tk + tn) * f32   # double-buffered ins
    outputs = 2 * 2 * tm * tn * f32                        # double-buffered outs
    acc = 2 * tm * tn * f32                                # two f32 accumulators
    est = inputs + outputs + acc
    # At least the default scoped 32 MiB, but stay well under v7x's 64 MiB VMEM.
    return int(min(max(2 * est, 32 * 1024 * 1024), 48 * 1024 * 1024))


def linear_mn_forward(inputs_mean, inputs_variance, weight, bias,
                      mult_noise_variance, *, tm=None, tn=None, tk=None,
                      mxu_dtype=jnp.float32):
    """Forward pass of LinearMN. Returns (outputs_mean, outputs_variance)."""
    B, in_f = inputs_mean.shape
    out_f, in_f_w = weight.shape
    assert in_f_w == in_f

    f32 = jnp.float32
    if bias is None:
        bias = jnp.zeros((out_f,), f32)

    # softplus computed once in the wrapper (not per K grid step).
    sp = jax.nn.softplus(mult_noise_variance.astype(f32))

    # Lane/MXU-friendly tile sizes (overridable).
    if tm is None:
        tm = min(_round_up(B, 8), 256)
    if tn is None:
        tn = min(_round_up(out_f, 128), 256)
    if tk is None:
        tk = min(_round_up(in_f, 128), 512)

    Bp = _round_up(B, tm)
    Np = _round_up(out_f, tn)
    Kp = _round_up(in_f, tk)

    xm = _pad2d(inputs_mean.astype(f32), Bp, Kp)
    xv = _pad2d(inputs_variance.astype(f32), Bp, Kp)
    w = _pad2d(weight.astype(f32), Np, Kp)
    sp2 = _pad2d(sp.reshape(1, in_f), 1, Kp)      # zero pad => no K-pad leakage
    b2 = _pad2d(bias.astype(f32).reshape(1, out_f), 1, Np)

    grid = (Bp // tm, Np // tn, Kp // tk)

    out_mean, out_var = pl.pallas_call(
        partial(_linear_mn_kernel, mxu_dtype=mxu_dtype),
        out_shape=(
            jax.ShapeDtypeStruct((Bp, Np), f32),
            jax.ShapeDtypeStruct((Bp, Np), f32),
        ),
        grid_spec=pltpu.PrefetchScalarGridSpec(
            num_scalar_prefetch=0,
            grid=grid,
            in_specs=[
                pl.BlockSpec((1, tk), lambda i, j, k: (0, k)),    # softplus(mnv)
                pl.BlockSpec((tm, tk), lambda i, j, k: (i, k)),   # inputs_mean
                pl.BlockSpec((tm, tk), lambda i, j, k: (i, k)),   # inputs_variance
                pl.BlockSpec((tn, tk), lambda i, j, k: (j, k)),   # weight
                pl.BlockSpec((1, tn), lambda i, j, k: (0, j)),    # bias
            ],
            out_specs=(
                pl.BlockSpec((tm, tn), lambda i, j, k: (i, j)),   # outputs_mean
                pl.BlockSpec((tm, tn), lambda i, j, k: (i, j)),   # outputs_variance
            ),
            scratch_shapes=[
                pltpu.VMEM((tm, tn), jnp.float32),                # mean accumulator
                pltpu.VMEM((tm, tn), jnp.float32),                # variance accumulator
            ],
        ),
        compiler_params=pltpu.CompilerParams(
            dimension_semantics=("parallel", "parallel", "arbitrary"),
            vmem_limit_bytes=_vmem_limit_bytes(tm, tn, tk),
        ),
    )(sp2, xm, xv, w, b2)

    return out_mean[:B, :out_f], out_var[:B, :out_f]


def _reference(inputs_mean, inputs_variance, weight, bias, mnv):
    sp = jax.nn.softplus(mnv)
    om = inputs_mean @ weight.T + bias
    ov = ((1.0 + sp) * inputs_variance + sp * inputs_mean**2) @ (weight**2).T
    return om, ov


if __name__ == "__main__":
    # --- Small shapes consistent with the module (in=32, out=16, batch=8). ---
    batch = 8
    in_features = 32
    out_features = 16
    mnv_init = -3.0

    key = jax.random.PRNGKey(0)
    k1, k2, k3, k4 = jax.random.split(key, 4)

    bound = 1.0 / math.sqrt(in_features)
    weight = jax.random.uniform(
        k1, (out_features, in_features), jnp.float32, -bound, bound)
    bias = jax.random.uniform(k2, (out_features,), jnp.float32, -bound, bound)
    mult_noise_variance = jnp.ones((in_features,), jnp.float32) * mnv_init

    inputs_mean = jax.random.normal(k3, (batch, in_features), jnp.float32)
    inputs_variance = jax.nn.softplus(
        jax.random.normal(k4, (batch, in_features), jnp.float32))

    out_mean, out_var = linear_mn_forward(
        inputs_mean, inputs_variance, weight, bias, mult_noise_variance)
    jax.block_until_ready((out_mean, out_var))

    ref_mean, ref_var = _reference(
        inputs_mean, inputs_variance, weight, bias, mult_noise_variance)

    assert out_mean.shape == (batch, out_features)
    assert out_var.shape == (batch, out_features)
    assert jnp.allclose(out_mean, ref_mean, atol=1e-5, rtol=1e-5)
    assert jnp.allclose(out_var, ref_var, atol=1e-5, rtol=1e-5)

    # --- Second check: force a multi-step (i, j, k) grid so accumulator init /
    # K-reduction / bias epilogue paths are exercised on-device. ---
    B2, I2, O2 = 16, 256, 256
    kk = jax.random.split(jax.random.PRNGKey(1), 4)
    b2d = 1.0 / math.sqrt(I2)
    w2 = jax.random.uniform(kk[0], (O2, I2), jnp.float32, -b2d, b2d)
    bias2 = jax.random.uniform(kk[1], (O2,), jnp.float32, -b2d, b2d)
    mnv2 = jnp.full((I2,), mnv_init, jnp.float32)
    xm2 = jax.random.normal(kk[2], (B2, I2), jnp.float32)
    xv2 = jax.nn.softplus(jax.random.normal(kk[3], (B2, I2), jnp.float32))

    om2, ov2 = linear_mn_forward(
        xm2, xv2, w2, bias2, mnv2, tm=8, tn=128, tk=128)   # grid = (2, 2, 2)
    jax.block_until_ready((om2, ov2))
    rm2, rv2 = _reference(xm2, xv2, w2, bias2, mnv2)
    assert jnp.allclose(om2, rm2, atol=1e-4, rtol=1e-4)
    assert jnp.allclose(ov2, rv2, atol=1e-4, rtol=1e-4)

    print("KERNEL_OK")
</pallas_src>

<mosaic_0001>
module attributes {stable_mosaic.version = 11 : i64} {
  func.func @_linear_mn_kernel(%arg0: i32, %arg1: i32, %arg2: i32, %arg3: memref<1x128xf32, #tpu.memory_space<vmem>>, %arg4: memref<8x128xf32, #tpu.memory_space<vmem>>, %arg5: memref<8x128xf32, #tpu.memory_space<vmem>>, %arg6: memref<128x128xf32, #tpu.memory_space<vmem>>, %arg7: memref<1x128xf32, #tpu.memory_space<vmem>>, %arg8: memref<8x128xf32, #tpu.memory_space<vmem>>, %arg9: memref<8x128xf32, #tpu.memory_space<vmem>>, %arg10: memref<8x128xf32, #tpu.memory_space<vmem>>, %arg11: memref<8x128xf32, #tpu.memory_space<vmem>>) attributes {dimension_semantics = [#tpu.dimension_semantics<parallel>, #tpu.dimension_semantics<parallel>, #tpu.dimension_semantics<arbitrary>], iteration_bounds = array<i64: 1, 1, 1>, scalar_prefetch = 0 : i64, scratch_operands = 2 : i64, tpu.core_type = #tpu.core_type<tc>, window_params = [{transform_indices = @transform_0, window_bounds = array<i64: 1, 128>}, {transform_indices = @transform_1, window_bounds = array<i64: 8, 128>}, {transform_indices = @transform_2, window_bounds = array<i64: 8, 128>}, {transform_indices = @transform_3, window_bounds = array<i64: 128, 128>}, {transform_indices = @transform_4, window_bounds = array<i64: 1, 128>}, {transform_indices = @transform_5, window_bounds = array<i64: 8, 128>}, {transform_indices = @transform_6, window_bounds = array<i64: 8, 128>}]} {
    %c0_i32 = arith.constant 0 : i32
    %0 = arith.cmpi eq, %arg2, %c0_i32 : i32
    %1 = arith.extui %0 : i1 to i32
    %c0_i32_0 = arith.constant 0 : i32
    %2 = arith.cmpi ne, %1, %c0_i32_0 : i32
    scf.if %2 {
      %cst_20 = arith.constant 0.000000e+00 : f32
      %27 = vector.broadcast %cst_20 : f32 to vector<8x128xf32>
      %c0_21 = arith.constant 0 : index
      %c0_22 = arith.constant 0 : index
      %28 = vector.load %arg10[%c0_21, %c0_22] : memref<8x128xf32, #tpu.memory_space<vmem>>, vector<8x128xf32>
      tpu.vector_store %arg10[%c0_21, %c0_22], %27 {strides = array<i32>} : memref<8x128xf32, #tpu.memory_space<vmem>>, vector<8x128xf32>,
      %cst_23 = arith.constant 0.000000e+00 : f32
      %29 = vector.broadcast %cst_23 : f32 to vector<8x128xf32>
      %c0_24 = arith.constant 0 : index
      %c0_25 = arith.constant 0 : index
      %30 = vector.load %arg11[%c0_24, %c0_25] : memref<8x128xf32, #tpu.memory_space<vmem>>, vector<8x128xf32>
      tpu.vector_store %arg11[%c0_24, %c0_25], %29 {strides = array<i32>} : memref<8x128xf32, #tpu.memory_space<vmem>>, vector<8x128xf32>,
    } else {
    }
    %c0 = arith.constant 0 : index
    %c0_1 = arith.constant 0 : index
    %3 = vector.load %arg4[%c0, %c0_1] : memref<8x128xf32, #tpu.memory_space<vmem>>, vector<8x128xf32>
    %c0_2 = arith.constant 0 : index
    %c0_3 = arith.constant 0 : index
    %4 = vector.load %arg5[%c0_2, %c0_3] : memref<8x128xf32, #tpu.memory_space<vmem>>, vector<8x128xf32>
    %c0_4 = arith.constant 0 : index
    %c0_5 = arith.constant 0 : index
    %5 = vector.load %arg6[%c0_4, %c0_5] : memref<128x128xf32, #tpu.memory_space<vmem>>, vector<128x128xf32>
    %c0_6 = arith.constant 0 : index
    %c0_7 = arith.constant 0 : index
    %6 = vector.load %arg3[%c0_6, %c0_7] : memref<1x128xf32, #tpu.memory_space<vmem>>, vector<1x128xf32>
    %c0_8 = arith.constant 0 : index
    %c0_9 = arith.constant 0 : index
    %7 = vector.load %arg10[%c0_8, %c0_9] : memref<8x128xf32, #tpu.memory_space<vmem>>, vector<8x128xf32>
    %cst = arith.constant dense<0.000000e+00> : vector<8x128xf32>
    %8 = tpu.matmul %3, %5, %cst {dimension_numbers = #tpu.dot_dimension_numbers<[1], [1], [0], [0], [0, 0, 1, 0], [], []>} : vector<8x128xf32>, vector<128x128xf32>, vector<8x128xf32> -> vector<8x128xf32>
    %9 = arith.addf %7, %8 : vector<8x128xf32>
    %c0_10 = arith.constant 0 : index
    %c0_11 = arith.constant 0 : index
    %10 = vector.load %arg10[%c0_10, %c0_11] : memref<8x128xf32, #tpu.memory_space<vmem>>, vector<8x128xf32>
    tpu.vector_store %arg10[%c0_10, %c0_11], %9 {strides = array<i32>} : memref<8x128xf32, #tpu.memory_space<vmem>>, vector<8x128xf32>,
    %cst_12 = arith.constant 1.000000e+00 : f32
    %11 = vector.broadcast %cst_12 : f32 to vector<1x128xf32>
    %12 = arith.addf %11, %6 : vector<1x128xf32>
    %13 = vector.broadcast %12 : vector<1x128xf32> to vector<8x128xf32>
    %14 = arith.mulf %13, %4 : vector<8x128xf32>
    %15 = arith.mulf %3, %3 : vector<8x128xf32>
    %16 = vector.broadcast %6 : vector<1x128xf32> to vector<8x128xf32>
    %17 = arith.mulf %16, %15 : vector<8x128xf32>
    %18 = arith.addf %14, %17 : vector<8x128xf32>
    %19 = arith.mulf %5, %5 : vector<128x128xf32>
    %c0_13 = arith.constant 0 : index
    %c0_14 = arith.constant 0 : index
    %20 = vector.load %arg11[%c0_13, %c0_14] : memref<8x128xf32, #tpu.memory_space<vmem>>, vector<8x128xf32>
    %cst_15 = arith.constant dense<0.000000e+00> : vector<8x128xf32>
    %21 = tpu.matmul %18, %19, %cst_15 {dimension_numbers = #tpu.dot_dimension_numbers<[1], [1], [0], [0], [0, 0, 1, 0], [], []>} : vector<8x128xf32>, vector<128x128xf32>, vector<8x128xf32> -> vector<8x128xf32>
    %22 = arith.addf %20, %21 : vector<8x128xf32>
    %c0_16 = arith.constant 0 : index
    %c0_17 = arith.constant 0 : index
    %23 = vector.load %arg11[%c0_16, %c0_17] : memref<8x128xf32, #tpu.memory_space<vmem>>, vector<8x128xf32>
    tpu.vector_store %arg11[%c0_16, %c0_17], %22 {strides = array<i32>} : memref<8x128xf32, #tpu.memory_space<vmem>>, vector<8x128xf32>,
    %c0_i32_18 = arith.constant 0 : i32
    %24 = arith.cmpi eq, %arg2, %c0_i32_18 : i32
    %25 = arith.extui %24 : i1 to i32
    %c0_i32_19 = arith.constant 0 : i32
    %26 = arith.cmpi ne, %25, %c0_i32_19 : i32
    scf.if %26 {
      %c0_20 = arith.constant 0 : index
      %c0_21 = arith.constant 0 : index
      %27 = vector.load %arg10[%c0_20, %c0_21] : memref<8x128xf32, #tpu.memory_space<vmem>>, vector<8x128xf32>
      %c0_22 = arith.constant 0 : index
      %c0_23 = arith.constant 0 : index
      %28 = vector.load %arg7[%c0_22, %c0_23] : memref<1x128xf32, #tpu.memory_space<vmem>>, vector<1x128xf32>
      %29 = vector.broadcast %28 : vector<1x128xf32> to vector<8x128xf32>
      %30 = arith.addf %27, %29 : vector<8x128xf32>
      %c0_24 = arith.constant 0 : index
      %c0_25 = arith.constant 0 : index
      %31 = vector.load %arg8[%c0_24, %c0_25] : memref<8x128xf32, #tpu.memory_space<vmem>>, vector<8x128xf32>
      tpu.vector_store %arg8[%c0_24, %c0_25], %30 {strides = array<i32>} : memref<8x128xf32, #tpu.memory_space<vmem>>, vector<8x128xf32>,
      %c0_26 = arith.constant 0 : index
      %c0_27 = arith.constant 0 : index
      %32 = vector.load %arg11[%c0_26, %c0_27] : memref<8x128xf32, #tpu.memory_space<vmem>>, vector<8x128xf32>
      %c0_28 = arith.constant 0 : index
      %c0_29 = arith.constant 0 : index
      %33 = vector.load %arg9[%c0_28, %c0_29] : memref<8x128xf32, #tpu.memory_space<vmem>>, vector<8x128xf32>
      tpu.vector_store %arg9[%c0_28, %c0_29], %32 {strides = array<i32>} : memref<8x128xf32, #tpu.memory_space<vmem>>, vector<8x128xf32>,
    } else {
    }
    return
  }
  func.func @transform_0(%arg0: i32, %arg1: i32, %arg2: i32) -> (i32, i32) {
    %c0_i32 = arith.constant 0 : i32
    %c0_i32_0 = arith.constant 0 : i32
    return %c0_i32, %arg2 : i32, i32
  }
  func.func @transform_1(%arg0: i32, %arg1: i32, %arg2: i32) -> (i32, i32) {
    %c0_i32 = arith.constant 0 : i32
    return %arg0, %arg2 : i32, i32
  }
  func.func @transform_2(%arg0: i32, %arg1: i32, %arg2: i32) -> (i32, i32) {
    %c0_i32 = arith.constant 0 : i32
    return %arg0, %arg2 : i32, i32
  }
  func.func @transform_3(%arg0: i32, %arg1: i32, %arg2: i32) -> (i32, i32) {
    %c0_i32 = arith.constant 0 : i32
    return %arg1, %arg2 : i32, i32
  }
  func.func @transform_4(%arg0: i32, %arg1: i32, %arg2: i32) -> (i32, i32) {
    %c0_i32 = arith.constant 0 : i32
    %c0_i32_0 = arith.constant 0 : i32
    return %c0_i32, %arg1 : i32, i32
  }
  func.func @transform_5(%arg0: i32, %arg1: i32, %arg2: i32) -> (i32, i32) {
    %c0_i32 = arith.constant 0 : i32
    return %arg0, %arg1 : i32, i32
  }
  func.func @transform_6(%arg0: i32, %arg1: i32, %arg2: i32) -> (i32, i32) {
    %c0_i32 = arith.constant 0 : i32
    return %arg0, %arg1 : i32, i32
  }
}

</mosaic_0001>

<bundles_post_ra>
// kernel: tpu_custom_call.1
= control target key start
LH: loop header
LB: loop body
LE: loop exit
PB: predicated region body
PF: predicated region fallthrough
CT: control target
= control target key end

     0   :  { %12 = vsyncpa [#allocation5], 0  ;;  %s780_s0 = inlined_call_operand.hbm [shape: f32[1,128], index: 0, kind: input, shape index: {}]   ;;  %s781_s1 = inlined_call_operand.hbm [shape: f32[8,128], index: 1, kind: input, shape index: {}]   ;;  %s782_s2 = inlined_call_operand.hbm [shape: f32[8,128], index: 2, kind: input, shape index: {}]   ;;  %s783_s3 = inlined_call_operand.hbm [shape: f32[128,128], index: 3, kind: input, shape index: {}]   ;;  %s784_s4 = inlined_call_operand.vmem [shape: f32[1,128], index: 4, kind: input, shape index: {}]   ;;  %s785_s5 = inlined_call_operand.hbm [shape: f32[8,128], index: 5, kind: output, shape index: {0}]   ;;  %s786_s6 = inlined_call_operand.hbm [shape: f32[8,128], index: 6, kind: output, shape index: {1}]  }
   0x1   :  { %13 = vsyncpa [#allocation8], 0 }
   0x2   :  { %14 = vsyncpa [#allocation11], 0 }
   0x3   :  { %15 = vsyncpa [#allocation6], 0 }
   0x4   :  { %16 = vsyncpa [#allocation14], 0  ;;  %s629_s21 = smov [#allocation7]   ;;  %s630_s23 = smov [#allocation4]  }
   0x5   :  { %s33_s22 = sshll.u32 %s629_s21, 4  ;;  %s23_s24 = sshll.u32 %s630_s23, 4  ;;  %s34_s22 = int_to_ptr.vmem [resolvable:$true] %s33_s22  ;;  %s24_s24 = int_to_ptr.vmem [resolvable:$true] %s23_s24 }
   0x6   :  { %s487_s27 = scalar_lea.hbm %s781_s1, 128 }
   0x7   :  { %p488_p0 = scmp.ne.s32.totalorder %s781_s1, %s487_s27  ;;  %p491_p1 = scmp.lt.u32.totalorder %s487_s27, %s781_s1 }
   0x9   :  { %p493_p2 = pnand %p491_p1, %p488_p0 }
   0xb   :  { %496 = shalt.err (!%p493_p2)
}
   0xc   :  { %s497_s8 = scalar_lea.vmem %s34_s22, 128  ;;  %p502_p4 = scmp.lt.s32.totalorder %s34_s22, %s34_s22 }
   0xd   :  { %p498_p3 = scmp.ne.s32.totalorder %s34_s22, %s497_s8  ;;  %p503_p5 = scmp.lt.s32.totalorder %s497_s8, %s497_s8 }
   0xf   :  { %p504_p6 = por %p503_p5, %p502_p4 }
  0x11   :  { %p505_p7 = pnand %p504_p6, %p498_p3 }
  0x13   :  { %508 = shalt.err (!%p505_p7)
}
  0x14   :  { %36 = dma.hbm_to_vmem [thread:$0]  %s781_s1, 128, %s34_s22, [#allocation8]  }
  0x15   :  { %s509_s13 = scalar_lea.hbm %s780_s0, 16 }
  0x16   :  { %p510_p8 = scmp.ne.s32.totalorder %s780_s0, %s509_s13  ;;  %p513_p9 = scmp.lt.u32.totalorder %s509_s13, %s780_s0 }
  0x18   :  { %p515_p10 = pnand %p513_p9, %p510_p8 }
  0x1a   :  { %518 = shalt.err (!%p515_p10)
}
  0x1b   :  { %s519_s18 = scalar_lea.vmem %s24_s24, 16  ;;  %s523_s19 = scalar_lea.vmem %s24_s24, 32 }
  0x1c   :  { %p520_p11 = scmp.ne.s32.totalorder %s24_s24, %s519_s18  ;;  %p524_p12 = scmp.lt.s32.totalorder %s24_s24, %s24_s24 }
  0x1d   :  { %p525_p13 = scmp.lt.s32.totalorder %s523_s19, %s519_s18 }
  0x1f   :  { %p526_p0 = por %p525_p13, %p524_p12 }
  0x21   :  { %p527_p1 = pnand %p526_p0, %p520_p11 }
  0x23   :  { %530 = shalt.err (!%p527_p1)
}
  0x24   :  { %26 = dma.hbm_to_vmem [thread:$0]  %s780_s0, 16, %s24_s24, [#allocation5]  }
  0x25   :  { %s631_s21 = smov [#allocation9]   ;;  %s632_s23 = smov [#allocation10]  }
  0x26   :  { %s43_s22 = sshll.u32 %s631_s21, 4  ;;  %s52_s25 = sshll.u32 %s632_s23, 4  ;;  %s44_s22 = int_to_ptr.vmem [resolvable:$true] %s43_s22  ;;  %s699_s25 = int_to_ptr.vmem [resolvable:$true] %s52_s25 }
  0x27   :  { %s531_s28 = scalar_lea.hbm %s782_s2, 128 }
  0x28   :  { %p532_p2 = scmp.ne.s32.totalorder %s782_s2, %s531_s28  ;;  %p535_p3 = scmp.lt.u32.totalorder %s531_s28, %s782_s2 }
  0x2a   :  { %p537_p4 = pnand %p535_p3, %p532_p2 }
  0x2c   :  { %540 = shalt.err (!%p537_p4)
}
  0x2d   :  { %s541_s0 = scalar_lea.vmem %s44_s22, 128  ;;  %p546_p6 = scmp.lt.s32.totalorder %s44_s22, %s44_s22 }
  0x2e   :  { %p542_p5 = scmp.ne.s32.totalorder %s44_s22, %s541_s0  ;;  %p547_p7 = scmp.lt.s32.totalorder %s541_s0, %s541_s0 }
  0x30   :  { %p548_p8 = por %p547_p7, %p546_p6 }
  0x32   :  { %p549_p9 = pnand %p548_p8, %p542_p5 }
  0x34   :  { %552 = shalt.err (!%p549_p9)
}
  0x35   :  { %46 = dma.hbm_to_vmem [thread:$0]  %s782_s2, 128, %s44_s22, [#allocation8]  }
  0x36   :  { %s553_s12 = scalar_lea.hbm %s783_s3, 2048 }
  0x37   :  { %p554_p10 = scmp.ne.s32.totalorder %s783_s3, %s553_s12  ;;  %p557_p11 = scmp.lt.u32.totalorder %s553_s12, %s783_s3 }
  0x39   :  { %p559_p12 = pnand %p557_p11, %p554_p10 }
  0x3b   :  { %562 = shalt.err (!%p559_p12)
}
  0x3c   :  { %s563_s17 = scalar_lea.vmem %s699_s25, 2048  ;;  %p568_p0 = scmp.lt.s32.totalorder %s699_s25, %s699_s25 }
  0x3d   :  { %p564_p13 = scmp.ne.s32.totalorder %s699_s25, %s563_s17  ;;  %p569_p1 = scmp.lt.s32.totalorder %s563_s17, %s563_s17 }
  0x3f   :  { %p570_p2 = por %p569_p1, %p568_p0 }
  0x41   :  { %p571_p3 = pnand %p570_p2, %p564_p13 }
  0x43   :  { %574 = shalt.err (!%p571_p3)
}
  0x44   :  { %s633_s2 = smov 128   ;;  %s634_s18 = smov 8  }
  0x45   :  { %58 = dma.hbm_to_vmem [thread:$0]  %s783_s3, 2048, %s699_s25, [#allocation11], %s633_s2, %s633_s2, %s634_s18  }
  0x46   :  { %619 = dma.done.wait [#allocation5], 16  }
  0x47   :  { %620 = vsyncadd [#allocation5], 4294967280 }
  0x48   :  { %621 = dma.done.wait [#allocation8], 256  }
  0x49   :  { %622 = vsyncadd [#allocation8], 4294967040 }
  0x4a   :  { %623 = dma.done.wait [#allocation11], 2048  }
  0x4b   :  { %624 = vsyncadd [#allocation11], 4294965248  ;;  %v635_v0 = vmov 0.0|0.0   ;;  %vm636_vm0 = vmmov 0   ;;  %v637_v1 = vmov 0.0   ;;  %v81_v2 = vld [vmem:[#allocation10] sm:$0xff]  ;;  %v173_v40 = vlaneseq }
  0x4c   :  { %428 = vmatprep.subr.bf16.mxu0 %v635_v0  ;;  %452 = vmatprep.subr.bf16.mxu1 %v635_v0  ;;  %v82_v3 = vld [vmem:[#allocation10 + $0x8] sm:$0xff]  ;;  %v188_v5 = vmul.f32 %v81_v2, %v81_v2  ;;  %v83_v7 = vld [vmem:[#allocation10 + $0x10] sm:$0xff]  ;;  %v84_v8 = vld [vmem:[#allocation10 + $0x18] sm:$0xff]  ;;  %s638_s21 = smov [#allocation12]   ;;  %s639_s23 = smov [#allocation13]  }
  0x4d   :  { %390 = vmatprep.mubr.msk.f32.mxu0 %vm636_vm0, %v637_v1  ;;  %425 = vmatprep.mubr.msk.f32.mxu1 %vm636_vm0, %v637_v1  ;;  %v429_v4 = vpack.c.bf16 %v82_v3, %v81_v2  ;;  %v189_v6 = vmul.f32 %v82_v3, %v82_v3  ;;  %v190_v10 = vmul.f32 %v83_v7, %v83_v7  ;;  %v85_v14 = vld [vmem:[#allocation10 + $0x20] sm:$0xff]  ;;  %v86_v15 = vld [vmem:[#allocation10 + $0x28] sm:$0xff]  ;;  %v87_v20 = vld [vmem:[#allocation10 + $0x30] sm:$0xff]  ;;  %v174_v44 = vshrl.u32 %v173_v40, 7  ;;  %s298_s22 = sshll.u32 %s638_s21, 4  ;;  %s308_s25 = sshll.u32 %s639_s23, 4  ;;  %s299_s22 = int_to_ptr.vmem [resolvable:$true] %s298_s22  ;;  %s749_s25 = int_to_ptr.vmem [resolvable:$true] %s308_s25 }
  0x4e   :  { %v191_v11 = vmul.f32 %v84_v8, %v84_v8  ;;  %v432_v12 = vpack.c.bf16 %v84_v8, %v83_v7  ;;  %v192_v16 = vmul.f32 %v85_v14, %v85_v14  ;;  %v193_v17 = vmul.f32 %v86_v15, %v86_v15  ;;  %v88_v21 = vld [vmem:[#allocation10 + $0x38] sm:$0xff]  ;;  %v89_v26 = vld [vmem:[#allocation10 + $0x40] sm:$0xff]  ;;  %v90_v27 = vld [vmem:[#allocation10 + $0x48] sm:$0xff]  ;;  %s575_s26 = scalar_lea.vmem %s299_s22, 128  ;;  %p580_p5 = scmp.lt.s32.totalorder %s299_s22, %s299_s22 }
  0x4f   :  { %430 = vmatpush3.bf16.xpose.msra.mxu0 %v429_v4  ;;  %v453_v9 = vpack.c.bf16 %v189_v6, %v188_v5  ;;  %v435_v18 = vpack.c.bf16 %v86_v15, %v85_v14  ;;  %v194_v22 = vmul.f32 %v87_v20, %v87_v20  ;;  %v195_v23 = vmul.f32 %v88_v21, %v88_v21  ;;  %v91_v32 = vld [vmem:[#allocation10 + $0x50] sm:$0xff]  ;;  %v92_v33 = vld [vmem:[#allocation10 + $0x58] sm:$0xff]  ;;  %v93_v38 = vld [vmem:[#allocation10 + $0x60] sm:$0xff]  ;;  %p576_p4 = scmp.ne.s32.totalorder %s299_s22, %s575_s26  ;;  %p581_p6 = scmp.lt.s32.totalorder %s575_s26, %s575_s26 }
  0x50   :  { %431 = vmatprep.subr.bf16.mxu0 %v635_v0  ;;  %v456_v13 = vpack.c.bf16 %v191_v11, %v190_v10  ;;  %v459_v19 = vpack.c.bf16 %v193_v17, %v192_v16  ;;  %v438_v24 = vpack.c.bf16 %v88_v21, %v87_v20  ;;  %v196_v28 = vmul.f32 %v89_v26, %v89_v26  ;;  %v94_v39 = vld [vmem:[#allocation10 + $0x68] sm:$0xff]  ;;  %v95_v47 = vld [vmem:[#allocation10 + $0x70] sm:$0xff]  ;;  %v96_v48 = vld [vmem:[#allocation10 + $0x78] sm:$0xff] }
  0x51   :  { %454 = vmatpush3.bf16.xpose.msra.mxu1 %v453_v9  ;;  %v462_v25 = vpack.c.bf16 %v195_v23, %v194_v22  ;;  %v197_v29 = vmul.f32 %v90_v27, %v90_v27  ;;  %v441_v30 = vpack.c.bf16 %v90_v27, %v89_v26  ;;  %v198_v34 = vmul.f32 %v91_v32, %v91_v32  ;;  %v97_v46 = vld [vmem:[#allocation4] sm:$0x1]  ;;  %v79_v53 = vld [vmem:[#allocation7] sm:$0xff]  ;;  %v80_v59 = vld [vmem:[#allocation9] sm:$0xff]  ;;  %p582_p7 = por %p581_p6, %p580_p5 }
  0x52   :  { %455 = vmatprep.subr.bf16.mxu1 %v635_v0  ;;  %v199_v35 = vmul.f32 %v92_v33, %v92_v33  ;;  %v444_v36 = vpack.c.bf16 %v92_v33, %v91_v32  ;;  %v200_v41 = vmul.f32 %v93_v38, %v93_v38  ;;  %v201_v42 = vmul.f32 %v94_v39, %v94_v39  ;;  %v323_v63 = vld [vmem:[%s784_s4] ss:$0 sm:$0xff] }
  0x53   :  { %v465_v31 = vpack.c.bf16 %v197_v29, %v196_v28  ;;  %v447_v43 = vpack.c.bf16 %v94_v39, %v93_v38  ;;  %v171_v49 = vadd.f32 1.0, %v97_v46  ;;  %v175_v50 = vsub.s32 0, %v174_v44  ;;  %p583_p8 = pnand %p582_p7, %p576_p4 }
  0x54   :  { %v468_v37 = vpack.c.bf16 %v199_v35, %v198_v34  ;;  %v471_v45 = vpack.c.bf16 %v201_v42, %v200_v41  ;;  %v202_v51 = vmul.f32 %v95_v47, %v95_v47  ;;  %v203_v52 = vmul.f32 %v96_v48, %v96_v48 }
  0x55   :  { %v450_v54 = vpack.c.bf16 %v96_v48, %v95_v47  ;;  %v179_v55 = vmul.f32 %v79_v53, %v79_v53  ;;  %v184_v56 = vrot.slane %v97_v46, %v175_v50  ;;  %v176_v57 = vrot.slane %v171_v49, %v175_v50 }
  0x56   :  { %v474_v58 = vpack.c.bf16 %v203_v52, %v202_v51 }
  0x57   :  { %433 = vmatpush3.bf16.xpose.msra.mxu0 %v432_v12  ;;  %v186_v60 = vmul.f32 %v184_v56, %v179_v55  ;;  %v178_v61 = vmul.f32 %v176_v57, %v80_v59 }
  0x58   :  { %434 = vmatprep.subr.bf16.mxu0 %v635_v0 }
  0x59   :  { %457 = vmatpush3.bf16.xpose.msra.mxu1 %v456_v13  ;;  %v187_v62 = vadd.f32 %v186_v60, %v178_v61 }
  0x5a   :  { %458 = vmatprep.subr.bf16.mxu1 %v635_v0 }
  0x5f   :  { %436 = vmatpush3.bf16.xpose.msra.mxu0 %v435_v18 }
  0x60   :  { %437 = vmatprep.subr.bf16.mxu0 %v635_v0 }
  0x61   :  { %460 = vmatpush3.bf16.xpose.msra.mxu1 %v459_v19 }
  0x62   :  { %461 = vmatprep.subr.bf16.mxu1 %v635_v0 }
  0x67   :  { %439 = vmatpush3.bf16.xpose.msra.mxu0 %v438_v24 }
  0x68   :  { %440 = vmatprep.subr.bf16.mxu0 %v635_v0 }
  0x69   :  { %463 = vmatpush3.bf16.xpose.msra.mxu1 %v462_v25 }
  0x6a   :  { %464 = vmatprep.subr.bf16.mxu1 %v635_v0 }
  0x6f   :  { %442 = vmatpush3.bf16.xpose.msra.mxu0 %v441_v30 }
  0x70   :  { %443 = vmatprep.subr.bf16.mxu0 %v635_v0 }
  0x71   :  { %466 = vmatpush3.bf16.xpose.msra.mxu1 %v465_v31 }
  0x72   :  { %467 = vmatprep.subr.bf16.mxu1 %v635_v0 }
  0x77   :  { %445 = vmatpush3.bf16.xpose.msra.mxu0 %v444_v36 }
  0x78   :  { %446 = vmatprep.subr.bf16.mxu0 %v635_v0 }
  0x79   :  { %469 = vmatpush3.bf16.xpose.msra.mxu1 %v468_v37 }
  0x7a   :  { %470 = vmatprep.subr.bf16.mxu1 %v635_v0 }
  0x7f   :  { %448 = vmatpush3.bf16.xpose.msra.mxu0 %v447_v43 }
  0x80   :  { %449 = vmatprep.subr.bf16.mxu0 %v635_v0 }
  0x81   :  { %472 = vmatpush3.bf16.xpose.msra.mxu1 %v471_v45 }
  0x82   :  { %473 = vmatprep.subr.bf16.mxu1 %v635_v0 }
  0x87   :  { %451 = vmatpush3.bf16.xpose.msra.mxu0 %v450_v54 }
  0x89   :  { %475 = vmatpush3.bf16.xpose.msra.mxu1 %v474_v58 }
  0x8e   :  { %391 = vmatmul.mubr.f32.vlgmr.msra.gmra.mrb[0].mxu0 %v79_v53 }
  0x90   :  { %426 = vmatmul.mubr.f32.vlgmr.msra.gmra.mrb[0].mxu1 %v187_v62 }
 0x161   :  { %v165_v0 = vpop.f32.mrb[0].mxu0 }
 0x162   :  { %v288_v1 = vadd.f32 %v323_v63, %v165_v0  ;;  %v392_v2 = vpop.f32.mrb[1].mxu0 }
 0x163   :  { %v271_v3 = vpop.f32.mrb[0].mxu1 }
 0x164   :  { %289 = vst [vmem:[#allocation12] sm:$0xff] %v288_v1  ;;  %291 = vst [vmem:[#allocation13] sm:$0xff] %v271_v3  ;;  %v427_v4 = vpop.f32.mrb[1].mxu1 }
 0x165   :  { %586 = shalt.err (!%p583_p8)
}
 0x166   :  { %s587_s28 = scalar_lea.hbm %s785_s5, 128 }
 0x167   :  { %p588_p9 = scmp.ne.s32.totalorder %s785_s5, %s587_s28  ;;  %p591_p10 = scmp.lt.u32.totalorder %s587_s28, %s785_s5 }
 0x169   :  { %p593_p11 = pnand %p591_p10, %p588_p9 }
 0x16b   :  { %596 = shalt.err (!%p593_p11)
}
 0x16c   :  { %301 = dma.vmem_to_hbm [thread:$0]  %s299_s22, 128, %s785_s5, [#allocation6]  }
 0x16d   :  { %s597_s9 = scalar_lea.vmem %s749_s25, 128  ;;  %p602_p13 = scmp.lt.s32.totalorder %s749_s25, %s749_s25 }
 0x16e   :  { %p598_p12 = scmp.ne.s32.totalorder %s749_s25, %s597_s9  ;;  %p603_p0 = scmp.lt.s32.totalorder %s597_s9, %s597_s9 }
 0x170   :  { %p604_p1 = por %p603_p0, %p602_p13 }
 0x172   :  { %p605_p2 = pnand %p604_p1, %p598_p12 }
 0x174   :  { %608 = shalt.err (!%p605_p2)
}
 0x175   :  { %s609_s12 = scalar_lea.hbm %s786_s6, 128 }
 0x176   :  { %p610_p3 = scmp.ne.s32.totalorder %s786_s6, %s609_s12  ;;  %p613_p4 = scmp.lt.u32.totalorder %s609_s12, %s786_s6 }
 0x178   :  { %p615_p5 = pnand %p613_p4, %p610_p3 }
 0x17a   :  { %618 = shalt.err (!%p615_p5)
}
 0x17b   :  { %311 = dma.vmem_to_hbm [thread:$0]  %s749_s25, 128, %s786_s6, [#allocation14]  }
 0x17c   :  { %625 = dma.done.wait [#allocation6], 128  }
 0x17d   :  { %626 = vsyncadd [#allocation6], 4294967168 }
 0x17e   :  { %627 = dma.done.wait [#allocation14], 128  }
 0x17f   :  { %628 = vsyncadd [#allocation14], 4294967168 }
 0x180   :  { %318 = vsyncpa [#allocation5], 1 }
 0x181   :  { %319 = vsyncpa [#allocation8], 1 }
 0x182   :  { %320 = vsyncpa [#allocation11], 1 }
 0x183   :  { %321 = vsyncpa [#allocation6], 1 }
 0x184   :  { %322 = vsyncpa [#allocation14], 1 }

</bundles_post_ra>
